<compile_context>
chip_gen: v6e
topology: v6e:2x2x1
jax: 0.10.0
libtpu: 0.0.40
codegen_flags: <defaults>
</compile_context>

<pallas_src>
import functools

import jax
import jax.numpy as jnp
from jax.experimental import pallas as pl
from jax.experimental.pallas import tpu as pltpu

IN_DIM = 11
H1, H2, H3 = 128, 256, 256
OUT_DIM = 3
TB = 1024  # default batch row tile (sweepable via mlp_forward(..., tb=...))


def mlp_kernel(x_ref, w1_ref, b1_ref, w2_ref, b2_ref,
               w3_ref, b3_ref, w4_ref, b4_ref, o_ref):
    # Weights are bf16 and VMEM-resident (constant index maps). MXU matmuls
    # accumulate in f32; bias add + ReLU stay in f32 on the VPU.
    x = x_ref[...].astype(jnp.bfloat16)

    h = jnp.dot(x, w1_ref[...], preferred_element_type=jnp.float32) + b1_ref[...]
    h = jnp.maximum(h, 0.0)

    h = jnp.dot(h.astype(jnp.bfloat16), w2_ref[...],
                preferred_element_type=jnp.float32) + b2_ref[...]
    h = jnp.maximum(h, 0.0)

    h = jnp.dot(h.astype(jnp.bfloat16), w3_ref[...],
                preferred_element_type=jnp.float32) + b3_ref[...]
    h = jnp.maximum(h, 0.0)

    h = jnp.dot(h.astype(jnp.bfloat16), w4_ref[...],
                preferred_element_type=jnp.float32) + b4_ref[...]
    o_ref[...] = h.astype(o_ref.dtype)


def init_params(key):
    """f32 params mirroring PyTorch Linear's U(-1/sqrt(fan_in), 1/sqrt(fan_in)) init.

    Weights stored as (in_features, out_features) so the kernel computes
    y = x @ W + b, matching PyTorch's x @ W.T with its (out, in) storage.
    """
    dims = [(IN_DIM, H1), (H1, H2), (H2, H3), (H3, OUT_DIM)]
    params = {}
    keys = jax.random.split(key, 2 * len(dims))
    for i, (fan_in, fan_out) in enumerate(dims):
        bound = 1.0 / jnp.sqrt(jnp.float32(fan_in))
        params[f"w{i + 1}"] = jax.random.uniform(
            keys[2 * i], (fan_in, fan_out), minval=-bound, maxval=bound,
            dtype=jnp.float32)
        params[f"b{i + 1}"] = jax.random.uniform(
            keys[2 * i + 1], (1, fan_out), minval=-bound, maxval=bound,
            dtype=jnp.float32)
    return params


def prepare_params(params):
    """Cast weights to bf16 (half the DMA, full MXU rate); biases stay f32."""
    return {
        "w1": params["w1"].astype(jnp.bfloat16), "b1": params["b1"],
        "w2": params["w2"].astype(jnp.bfloat16), "b2": params["b2"],
        "w3": params["w3"].astype(jnp.bfloat16), "b3": params["b3"],
        "w4": params["w4"].astype(jnp.bfloat16), "b4": params["b4"],
    }


def _round_up(n, m):
    return -(-n // m) * m


def _pick_tile(B, tb):
    """Choose the batch row tile.

    - Large batches: use tb (multiple of 8) -> ragged last tile is handled by
      Pallas partial-block masking.
    - Medium batches (512..tb): split into two tiles so both v7x TensorCores
      get work via the "parallel" grid axis.
    - Small batches: a single tile equal to the full batch dim (always a legal
      block shape since it matches the array dim).
    """
    if B > tb:
        return tb
    if B >= 512:
        return _round_up(_round_up(B, 2) // 2, 8)
    return B


@functools.partial(jax.jit, static_argnames=("tb",))
def mlp_forward(x, prepared, tb=TB):
    """x: (B, 11) f32. Returns (B, 3) f32."""
    B = x.shape[0]
    tbe = _pick_tile(B, tb)
    n_tiles = pl.cdiv(B, tbe)

    matmul_macs = IN_DIM * H1 + H1 * H2 + H2 * H3 + H3 * OUT_DIM
    weight_bytes = 2 * matmul_macs + 4 * (H1 + H2 + H3 + OUT_DIM)
    cost = pl.CostEstimate(
        flops=2 * B * matmul_macs,
        transcendentals=0,
        bytes_accessed=B * (IN_DIM + OUT_DIM) * 4 + weight_bytes,
    )

    in_specs = [
        pl.BlockSpec((tbe, IN_DIM), lambda i: (i, 0)),     # x tile streams
        pl.BlockSpec((IN_DIM, H1), lambda i: (0, 0)),      # weights: resident
        pl.BlockSpec((1, H1), lambda i: (0, 0)),
        pl.BlockSpec((H1, H2), lambda i: (0, 0)),
        pl.BlockSpec((1, H2), lambda i: (0, 0)),
        pl.BlockSpec((H2, H3), lambda i: (0, 0)),
        pl.BlockSpec((1, H3), lambda i: (0, 0)),
        pl.BlockSpec((H3, OUT_DIM), lambda i: (0, 0)),
        pl.BlockSpec((1, OUT_DIM), lambda i: (0, 0)),
    ]
    out_specs = pl.BlockSpec((tbe, OUT_DIM), lambda i: (i, 0))

    return pl.pallas_call(
        mlp_kernel,
        out_shape=jax.ShapeDtypeStruct((B, OUT_DIM), jnp.float32),
        grid=(n_tiles,),
        in_specs=in_specs,
        out_specs=out_specs,
        compiler_params=pltpu.CompilerParams(
            dimension_semantics=("parallel",),
            vmem_limit_bytes=32 * 1024 * 1024),
        cost_estimate=cost,
    )(x,
      prepared["w1"], prepared["b1"],
      prepared["w2"], prepared["b2"],
      prepared["w3"], prepared["b3"],
      prepared["w4"], prepared["b4"])


def reference_forward_mixed(x, prepared):
    """Same mixed precision as the kernel (bf16 operands, f32 accumulation)."""
    h = jnp.maximum(jnp.dot(x.astype(jnp.bfloat16), prepared["w1"],
                            preferred_element_type=jnp.float32) + prepared["b1"], 0.0)
    h = jnp.maximum(jnp.dot(h.astype(jnp.bfloat16), prepared["w2"],
                            preferred_element_type=jnp.float32) + prepared["b2"], 0.0)
    h = jnp.maximum(jnp.dot(h.astype(jnp.bfloat16), prepared["w3"],
                            preferred_element_type=jnp.float32) + prepared["b3"], 0.0)
    return jnp.dot(h.astype(jnp.bfloat16), prepared["w4"],
                   preferred_element_type=jnp.float32) + prepared["b4"]


def reference_forward_f32(x, params):
    h = jnp.maximum(x @ params["w1"] + params["b1"], 0.0)
    h = jnp.maximum(h @ params["w2"] + params["b2"], 0.0)
    h = jnp.maximum(h @ params["w3"] + params["b3"], 0.0)
    return h @ params["w4"] + params["b4"]


if __name__ == "__main__":
    key = jax.random.PRNGKey(0)
    k_params, k_x1, k_x2, k_x3, k_x4 = jax.random.split(key, 5)
    params = init_params(k_params)
    prepared = prepare_params(params)

    # Exercise all tiling paths: single tiny tile (B=8), single full-batch
    # tile (B=300), two-way split with a ragged tail (B=1000), and multi-tile
    # with a ragged last tile (B=2500).
    for B, kx in ((8, k_x1), (300, k_x2), (1000, k_x3), (2500, k_x4)):
        x = jax.random.normal(kx, (B, IN_DIM), dtype=jnp.float32)
        out = jax.block_until_ready(mlp_forward(x, prepared))
        assert out.shape == (B, OUT_DIM)

        ref_mixed = reference_forward_mixed(x, prepared)
        assert jnp.allclose(out, ref_mixed, atol=2e-3, rtol=2e-3), \
            f"B={B}: mismatch vs mixed-precision reference"

        ref_f32 = reference_forward_f32(x, params)
        assert jnp.allclose(out, ref_f32, atol=1e-1, rtol=1e-1), \
            f"B={B}: mismatch vs f32 reference"

    print("KERNEL_OK")
</pallas_src>

<mosaic_0001>
module attributes {stable_mosaic.version = 11 : i64} {
  func.func @mlp_kernel(%arg0: i32, %arg1: memref<8x11xf32, #tpu.memory_space<vmem>>, %arg2: memref<11x128xbf16, #tpu.memory_space<vmem>>, %arg3: memref<1x128xf32, #tpu.memory_space<vmem>>, %arg4: memref<128x256xbf16, #tpu.memory_space<vmem>>, %arg5: memref<1x256xf32, #tpu.memory_space<vmem>>, %arg6: memref<256x256xbf16, #tpu.memory_space<vmem>>, %arg7: memref<1x256xf32, #tpu.memory_space<vmem>>, %arg8: memref<256x3xbf16, #tpu.memory_space<vmem>>, %arg9: memref<1x3xf32, #tpu.memory_space<vmem>>, %arg10: memref<8x3xf32, #tpu.memory_space<vmem>>) attributes {dimension_semantics = [#tpu.dimension_semantics<parallel>], iteration_bounds = array<i64: 1>, scalar_prefetch = 0 : i64, scratch_operands = 0 : i64, tpu.core_type = #tpu.core_type<tc>, window_params = [{transform_indices = @transform_0, window_bounds = array<i64: 8, 11>}, {pipeline_mode = #tpu.pipeline_mode<synchronous>, transform_indices = @transform_1, window_bounds = array<i64: 11, 128>}, {pipeline_mode = #tpu.pipeline_mode<synchronous>, transform_indices = @transform_2, window_bounds = array<i64: 1, 128>}, {pipeline_mode = #tpu.pipeline_mode<synchronous>, transform_indices = @transform_3, window_bounds = array<i64: 128, 256>}, {pipeline_mode = #tpu.pipeline_mode<synchronous>, transform_indices = @transform_4, window_bounds = array<i64: 1, 256>}, {pipeline_mode = #tpu.pipeline_mode<synchronous>, transform_indices = @transform_5, window_bounds = array<i64: 256, 256>}, {pipeline_mode = #tpu.pipeline_mode<synchronous>, transform_indices = @transform_6, window_bounds = array<i64: 1, 256>}, {pipeline_mode = #tpu.pipeline_mode<synchronous>, transform_indices = @transform_7, window_bounds = array<i64: 256, 3>}, {pipeline_mode = #tpu.pipeline_mode<synchronous>, transform_indices = @transform_8, window_bounds = array<i64: 1, 3>}, {transform_indices = @transform_9, window_bounds = array<i64: 8, 3>}]} {
    %c0 = arith.constant 0 : index
    %c0_0 = arith.constant 0 : index
    %0 = vector.load %arg1[%c0, %c0_0] : memref<8x11xf32, #tpu.memory_space<vmem>>, vector<8x11xf32>
    %1 = arith.truncf %0 : vector<8x11xf32> to vector<8x11xbf16>
    %c0_1 = arith.constant 0 : index
    %c0_2 = arith.constant 0 : index
    %2 = vector.load %arg2[%c0_1, %c0_2] : memref<11x128xbf16, #tpu.memory_space<vmem>>, vector<11x128xbf16>
    %cst = arith.constant dense<0.000000e+00> : vector<8x128xf32>
    %3 = tpu.matmul %1, %2, %cst {dimension_numbers = #tpu.dot_dimension_numbers<[1], [0], [0], [1], [0, 0, 1, 1], [], []>} : vector<8x11xbf16>, vector<11x128xbf16>, vector<8x128xf32> -> vector<8x128xf32>
    %c0_3 = arith.constant 0 : index
    %c0_4 = arith.constant 0 : index
    %4 = vector.load %arg3[%c0_3, %c0_4] : memref<1x128xf32, #tpu.memory_space<vmem>>, vector<1x128xf32>
    %5 = vector.broadcast %4 : vector<1x128xf32> to vector<8x128xf32>
    %6 = arith.addf %3, %5 : vector<8x128xf32>
    %cst_5 = arith.constant 0.000000e+00 : f32
    %7 = vector.broadcast %cst_5 : f32 to vector<8x128xf32>
    %8 = arith.maximumf %6, %7 : vector<8x128xf32>
    %9 = arith.truncf %8 : vector<8x128xf32> to vector<8x128xbf16>
    %c0_6 = arith.constant 0 : index
    %c0_7 = arith.constant 0 : index
    %10 = vector.load %arg4[%c0_6, %c0_7] : memref<128x256xbf16, #tpu.memory_space<vmem>>, vector<128x256xbf16>
    %cst_8 = arith.constant dense<0.000000e+00> : vector<8x256xf32>
    %11 = tpu.matmul %9, %10, %cst_8 {dimension_numbers = #tpu.dot_dimension_numbers<[1], [0], [0], [1], [0, 0, 1, 1], [], []>} : vector<8x128xbf16>, vector<128x256xbf16>, vector<8x256xf32> -> vector<8x256xf32>
    %c0_9 = arith.constant 0 : index
    %c0_10 = arith.constant 0 : index
    %12 = vector.load %arg5[%c0_9, %c0_10] : memref<1x256xf32, #tpu.memory_space<vmem>>, vector<1x256xf32>
    %13 = vector.broadcast %12 : vector<1x256xf32> to vector<8x256xf32>
    %14 = arith.addf %11, %13 : vector<8x256xf32>
    %cst_11 = arith.constant 0.000000e+00 : f32
    %15 = vector.broadcast %cst_11 : f32 to vector<8x256xf32>
    %16 = arith.maximumf %14, %15 : vector<8x256xf32>
    %17 = arith.truncf %16 : vector<8x256xf32> to vector<8x256xbf16>
    %c0_12 = arith.constant 0 : index
    %c0_13 = arith.constant 0 : index
    %18 = vector.load %arg6[%c0_12, %c0_13] : memref<256x256xbf16, #tpu.memory_space<vmem>>, vector<256x256xbf16>
    %cst_14 = arith.constant dense<0.000000e+00> : vector<8x256xf32>
    %19 = tpu.matmul %17, %18, %cst_14 {dimension_numbers = #tpu.dot_dimension_numbers<[1], [0], [0], [1], [0, 0, 1, 1], [], []>} : vector<8x256xbf16>, vector<256x256xbf16>, vector<8x256xf32> -> vector<8x256xf32>
    %c0_15 = arith.constant 0 : index
    %c0_16 = arith.constant 0 : index
    %20 = vector.load %arg7[%c0_15, %c0_16] : memref<1x256xf32, #tpu.memory_space<vmem>>, vector<1x256xf32>
    %21 = vector.broadcast %20 : vector<1x256xf32> to vector<8x256xf32>
    %22 = arith.addf %19, %21 : vector<8x256xf32>
    %cst_17 = arith.constant 0.000000e+00 : f32
    %23 = vector.broadcast %cst_17 : f32 to vector<8x256xf32>
    %24 = arith.maximumf %22, %23 : vector<8x256xf32>
    %25 = arith.truncf %24 : vector<8x256xf32> to vector<8x256xbf16>
    %c0_18 = arith.constant 0 : index
    %c0_19 = arith.constant 0 : index
    %26 = vector.load %arg8[%c0_18, %c0_19] : memref<256x3xbf16, #tpu.memory_space<vmem>>, vector<256x3xbf16>
    %cst_20 = arith.constant dense<0.000000e+00> : vector<8x3xf32>
    %27 = tpu.matmul %25, %26, %cst_20 {dimension_numbers = #tpu.dot_dimension_numbers<[1], [0], [0], [1], [0, 0, 1, 1], [], []>} : vector<8x256xbf16>, vector<256x3xbf16>, vector<8x3xf32> -> vector<8x3xf32>
    %c0_21 = arith.constant 0 : index
    %c0_22 = arith.constant 0 : index
    %28 = vector.load %arg9[%c0_21, %c0_22] : memref<1x3xf32, #tpu.memory_space<vmem>>, vector<1x3xf32>
    %29 = vector.broadcast %28 : vector<1x3xf32> to vector<8x3xf32>
    %30 = arith.addf %27, %29 : vector<8x3xf32>
    %c0_23 = arith.constant 0 : index
    %c0_24 = arith.constant 0 : index
    %31 = vector.load %arg10[%c0_23, %c0_24] : memref<8x3xf32, #tpu.memory_space<vmem>>, vector<8x3xf32>
    tpu.vector_store %arg10[%c0_23, %c0_24], %30 {strides = array<i32>} : memref<8x3xf32, #tpu.memory_space<vmem>>, vector<8x3xf32>,
    return
  }
  func.func @transform_0(%arg0: i32) -> (i32, i32) {
    %c0_i32 = arith.constant 0 : i32
    %c0_i32_0 = arith.constant 0 : i32
    return %arg0, %c0_i32 : i32, i32
  }
  func.func @transform_1(%arg0: i32) -> (i32, i32) {
    %c0_i32 = arith.constant 0 : i32
    %c0_i32_0 = arith.constant 0 : i32
    %c0_i32_1 = arith.constant 0 : i32
    return %c0_i32, %c0_i32_0 : i32, i32
  }
  func.func @transform_2(%arg0: i32) -> (i32, i32) {
    %c0_i32 = arith.constant 0 : i32
    %c0_i32_0 = arith.constant 0 : i32
    %c0_i32_1 = arith.constant 0 : i32
    return %c0_i32, %c0_i32_0 : i32, i32
  }
  func.func @transform_3(%arg0: i32) -> (i32, i32) {
    %c0_i32 = arith.constant 0 : i32
    %c0_i32_0 = arith.constant 0 : i32
    %c0_i32_1 = arith.constant 0 : i32
    return %c0_i32, %c0_i32_0 : i32, i32
  }
  func.func @transform_4(%arg0: i32) -> (i32, i32) {
    %c0_i32 = arith.constant 0 : i32
    %c0_i32_0 = arith.constant 0 : i32
    %c0_i32_1 = arith.constant 0 : i32
    return %c0_i32, %c0_i32_0 : i32, i32
  }
  func.func @transform_5(%arg0: i32) -> (i32, i32) {
    %c0_i32 = arith.constant 0 : i32
    %c0_i32_0 = arith.constant 0 : i32
    %c0_i32_1 = arith.constant 0 : i32
    return %c0_i32, %c0_i32_0 : i32, i32
  }
  func.func @transform_6(%arg0: i32) -> (i32, i32) {
    %c0_i32 = arith.constant 0 : i32
    %c0_i32_0 = arith.constant 0 : i32
    %c0_i32_1 = arith.constant 0 : i32
    return %c0_i32, %c0_i32_0 : i32, i32
  }
  func.func @transform_7(%arg0: i32) -> (i32, i32) {
    %c0_i32 = arith.constant 0 : i32
    %c0_i32_0 = arith.constant 0 : i32
    %c0_i32_1 = arith.constant 0 : i32
    return %c0_i32, %c0_i32_0 : i32, i32
  }
  func.func @transform_8(%arg0: i32) -> (i32, i32) {
    %c0_i32 = arith.constant 0 : i32
    %c0_i32_0 = arith.constant 0 : i32
    %c0_i32_1 = arith.constant 0 : i32
    return %c0_i32, %c0_i32_0 : i32, i32
  }
  func.func @transform_9(%arg0: i32) -> (i32, i32) {
    %c0_i32 = arith.constant 0 : i32
    %c0_i32_0 = arith.constant 0 : i32
    return %arg0, %c0_i32 : i32, i32
  }
}

</mosaic_0001>

<bundles_post_ra>
// kernel: mlp_forward.1
= control target key start
LH: loop header
LB: loop body
LE: loop exit
PB: predicated region body
PF: predicated region fallthrough
CT: control target
= control target key end

     0   :  { %14 = vsyncpa [#allocation3], 0  ;;  %s1206_s0 = inlined_call_operand.vmem [shape: f32[8,11], index: 0, kind: input, shape index: {}]   ;;  %s1207_s1 = inlined_call_operand.hbm [shape: bf16[11,128], index: 1, kind: input, shape index: {}]   ;;  %s1208_s2 = inlined_call_operand.hbm [shape: f32[1,128], index: 2, kind: input, shape index: {}]   ;;  %s1209_s3 = inlined_call_operand.vmem [shape: bf16[128,256], index: 3, kind: input, shape index: {}]   ;;  %s1210_s4 = inlined_call_operand.vmem [shape: f32[1,256], index: 4, kind: input, shape index: {}]   ;;  %s1211_s5 = inlined_call_operand.hbm [shape: bf16[256,256], index: 5, kind: input, shape index: {}]   ;;  %s1212_s6 = inlined_call_operand.vmem [shape: f32[1,256], index: 6, kind: input, shape index: {}]   ;;  %s1213_s7 = inlined_call_operand.vmem [shape: bf16[256,3], index: 7, kind: input, shape index: {}]   ;;  %s1214_s8 = inlined_call_operand.hbm [shape: f32[1,3], index: 8, kind: input, shape index: {}]   ;;  %s1215_s9 = inlined_call_operand.vmem [shape: f32[8,3], index: 9, kind: output, shape index: {}]  }
   0x1   :  { %15 = vsyncpa [#allocation5], 0 }
   0x2   :  { %16 = vsyncpa [#allocation8], 0  ;;  %s1024_s30 = smov [#allocation4]   ;;  %s1025_s11 = smov [#allocation2]  }
   0x3   :  { %s37_s10 = sshll.u32 %s1024_s30, 4  ;;  %s24_s12 = sshll.u32 %s1025_s11, 4  ;;  %s38_s10 = int_to_ptr.vmem [resolvable:$true] %s37_s10  ;;  %s25_s12 = int_to_ptr.vmem [resolvable:$true] %s24_s12 }
   0x4   :  { %s946_s13 = scalar_lea.vmem %s38_s10, 16  ;;  %s950_s14 = scalar_lea.vmem %s38_s10, 32 }
   0x5   :  { %p947_p0 = scmp.ne.s32.totalorder %s38_s10, %s946_s13  ;;  %p951_p1 = scmp.lt.s32.totalorder %s38_s10, %s38_s10 }
   0x6   :  { %p952_p2 = scmp.lt.s32.totalorder %s950_s14, %s946_s13 }
   0x8   :  { %p953_p3 = por %p952_p2, %p951_p1 }
   0xa   :  { %p954_p4 = pnand %p953_p3, %p947_p0 }
   0xc   :  { %957 = shalt.err (!%p954_p4)
}
   0xd   :  { %40 = dma.hbm_to_vmem [thread:$0]  %s1208_s2, 16, %s38_s10, [#allocation5]  }
   0xe   :  { %s966_s17 = scalar_lea.vmem %s25_s12, 128  ;;  %p971_p6 = scmp.lt.s32.totalorder %s25_s12, %s25_s12 }
   0xf   :  { %p967_p5 = scmp.ne.s32.totalorder %s25_s12, %s966_s17  ;;  %p972_p7 = scmp.lt.s32.totalorder %s966_s17, %s966_s17 }
  0x11   :  { %p973_p8 = por %p972_p7, %p971_p6 }
  0x13   :  { %p974_p9 = pnand %p973_p8, %p967_p5 }
  0x15   :  { %977 = shalt.err (!%p974_p9)
}
  0x16   :  { %s1026_s18 = smov 64   ;;  %s1027_s19 = smov 4  }
  0x17   :  { %30 = dma.hbm_to_vmem [thread:$0]  %s1207_s1, 128, %s25_s12, [#allocation3], %s1026_s18, %s1026_s18, %s1027_s19  }
  0x18   :  { %s1028_s22 = smov [#allocation6]  }
  0x19   :  { %s50_s23 = sshll.u32 %s1028_s22, 4  ;;  %s51_s23 = int_to_ptr.vmem [resolvable:$true] %s50_s23 }
  0x1a   :  { %s986_s24 = scalar_lea.vmem %s51_s23, 4096  ;;  %p991_p11 = scmp.lt.s32.totalorder %s51_s23, %s51_s23 }
  0x1b   :  { %p987_p10 = scmp.ne.s32.totalorder %s51_s23, %s986_s24  ;;  %p992_p12 = scmp.lt.s32.totalorder %s986_s24, %s986_s24 }
  0x1d   :  { %p993_p13 = por %p992_p12, %p991_p11 }
  0x1f   :  { %p994_p0 = pnand %p993_p13, %p987_p10 }
  0x21   :  { %997 = shalt.err (!%p994_p0)
}
  0x22   :  { %s1029_s2 = smov 128   ;;  %s1030_s25 = smov 8  }
  0x23   :  { %56 = dma.hbm_to_vmem [thread:$0]  %s1211_s5, 4096, %s51_s23, [#allocation5], %s1029_s2, %s1029_s2, %s1030_s25  }
  0x24   :  { %s1031_s28 = smov [#allocation7]  }
  0x25   :  { %s67_s29 = sshll.u32 %s1031_s28, 4  ;;  %s68_s29 = int_to_ptr.vmem [resolvable:$true] %s67_s29 }
  0x26   :  { %s1006_s1 = scalar_lea.vmem %s68_s29, 16  ;;  %s1010_s30 = scalar_lea.vmem %s68_s29, 32 }
  0x27   :  { %p1007_p1 = scmp.ne.s32.totalorder %s68_s29, %s1006_s1  ;;  %p1011_p2 = scmp.lt.s32.totalorder %s68_s29, %s68_s29 }
  0x28   :  { %p1012_p3 = scmp.lt.s32.totalorder %s1010_s30, %s1006_s1 }
  0x2a   :  { %p1013_p4 = por %p1012_p3, %p1011_p2 }
  0x2c   :  { %p1014_p5 = pnand %p1013_p4, %p1007_p1 }
  0x2e   :  { %1017 = shalt.err (!%p1014_p5)
}
  0x2f   :  { %70 = dma.hbm_to_vmem [thread:$0]  %s1214_s8, 16, %s68_s29, [#allocation8]  }
  0x30   :  { %1018 = dma.done.wait [#allocation3], 128  }
  0x31   :  { %1019 = vsyncadd [#allocation3], 4294967168 }
  0x32   :  { %1020 = dma.done.wait [#allocation5], 4112  }
  0x33   :  { %1021 = vsyncadd [#allocation5], 4294963184 }
  0x34   :  { %1022 = dma.done.wait [#allocation8], 16  }
  0x35   :  { %1023 = vsyncadd [#allocation8], 4294967280  ;;  %vm104_vm0 = vcmask 1044480   ;;  %v1032_v0 = vmov 0.0   ;;  %vm1033_vm1 = vmmov 0   ;;  %vm105_vm2 = vcmask 1045504  }
  0x36   :  { %831 = vmatprep.subr.bf16.mxu0 %v1032_v0  ;;  %833 = vmatprep.mubr.msk.bf16.mxu0 %vm1033_vm1, %v1032_v0  ;;  %v1034_v1 = vmov 65535   ;;  %v849_v4 = vld [vmem:[#allocation2] sm:$0x3f]   ;;  %v850_v7 = vld [vmem:[%s1209_s3 + $0x74] ss:$8 sps:$4 sm:$0xff]   ;;  %vm100_vm3 = vcmask 89088  }
  0x37   :  { %v106_v2 = vsel %vm104_vm0, 4294967295, %v1034_v1  ;;  %v84_v5 = vld [vmem:[%s1206_s0] sm:$0xff]  ;;  %v852_v8 = vld [vmem:[%s1209_s3 + $0x70] ss:$8 sps:$4 sm:$0xff]   ;;  %261 = vmatprep.subr.bf16.mxu1 %v850_v7  ;;  %v856_v12 = vld [vmem:[%s1209_s3 + $0x54] ss:$8 sps:$4 sm:$0xff]  }
  0x38   :  { %v107_v3 = vsel %vm105_vm2, %v106_v2, 0  ;;  %v85_v9 = vpack.c.bf16 %v84_v5, %v84_v5  ;;  %v853_v10 = vld [vmem:[%s1209_s3 + $0x64] ss:$8 sps:$4 sm:$0xff]   ;;  %262 = vmatpush1.bf16.msra.mxu1 %v852_v8  ;;  %v855_v11 = vld [vmem:[%s1209_s3 + $0x60] ss:$8 sps:$4 sm:$0xff]   ;;  %v1035_v24 = vmov 0  }
  0x39   :  { %v109_v6 = vand.u32 %v849_v4, %v107_v3  ;;  %263 = vmatprep.subr.bf16.mxu1 %v853_v10  ;;  %v858_v13 = vld [vmem:[%s1209_s3 + $0x50] ss:$8 sps:$4 sm:$0xff]   ;;  %v859_v14 = vld [vmem:[%s1209_s3 + $0x44] ss:$8 sps:$4 sm:$0xff]   ;;  %v861_v15 = vld [vmem:[%s1209_s3 + $0x40] ss:$8 sps:$4 sm:$0xff]   ;;  %293 = vmatprep.mubr.bf16.mxu1 %v1035_v24 }
  0x3a   :  { %v862_v16 = vld [vmem:[%s1209_s3 + $0x34] ss:$8 sps:$4 sm:$0xff]   ;;  %v864_v17 = vld [vmem:[%s1209_s3 + $0x30] ss:$8 sps:$4 sm:$0xff]   ;;  %v865_v18 = vld [vmem:[%s1209_s3 + $0x24] ss:$8 sps:$4 sm:$0xff]  }
  0x3b   :  { %832 = vmatpush3.bf16.msra.mxu0 %v109_v6  ;;  %v867_v19 = vld [vmem:[%s1209_s3 + $0x20] ss:$8 sps:$4 sm:$0xff]   ;;  %v868_v20 = vld [vmem:[%s1209_s3 + $0x14] ss:$8 sps:$4 sm:$0xff]   ;;  %v870_v21 = vld [vmem:[%s1209_s3 + $0x10] ss:$8 sps:$4 sm:$0xff]  }
  0x3c   :  { %264 = vmatpush1.bf16.msra.mxu1 %v855_v11  ;;  %v871_v22 = vld [vmem:[%s1209_s3 + $0x4] ss:$8 sps:$4 sm:$0xff]   ;;  %v873_v23 = vld [vmem:[%s1209_s3] ss:$8 sps:$4 sm:$0xff]   ;;  %v922_v1 = vld [vmem:[%s1213_s7 + $0x78] sm:$0xff]   ;;  %vm730_vm4 = vcmask 23552  }
  0x3d   :  { %265 = vmatprep.subr.bf16.mxu1 %v856_v12  ;;  %v874_v25 = vld [vmem:[#allocation6 + $0x70] ss:$8 sps:$4 sm:$0xff]   ;;  %v876_v26 = vld [vmem:[#allocation6 + $0x74] ss:$8 sps:$4 sm:$0xff]   ;;  %v879_v27 = vld [vmem:[#allocation6 + $0x64] ss:$8 sps:$4 sm:$0xff]  }
  0x3e   :  { %834 = vmatmul.mubr.msk.bf16.vlgmr.msra.gmra.mxu0 %vm100_vm3, %v85_v9  ;;  %510 = vmatprep.subr.bf16.mxu0 %v876_v26  ;;  %v877_v28 = vld [vmem:[#allocation6 + $0x60] ss:$8 sps:$4 sm:$0xff]   ;;  %v882_v29 = vld [vmem:[#allocation6 + $0x54] ss:$8 sps:$4 sm:$0xff]   ;;  %v880_v30 = vld [vmem:[#allocation6 + $0x50] ss:$8 sps:$4 sm:$0xff]  }
  0x3f   :  { %511 = vmatpush1.bf16.msra.mxu0 %v874_v25  ;;  %v885_v31 = vld [vmem:[#allocation6 + $0x44] ss:$8 sps:$4 sm:$0xff]   ;;  %v883_v32 = vld [vmem:[#allocation6 + $0x40] ss:$8 sps:$4 sm:$0xff]   ;;  %v888_v33 = vld [vmem:[#allocation6 + $0x34] ss:$8 sps:$4 sm:$0xff]  }
  0x40   :  { %266 = vmatpush1.bf16.msra.mxu1 %v858_v13  ;;  %512 = vmatprep.subr.bf16.mxu0 %v879_v27  ;;  %v886_v34 = vld [vmem:[#allocation6 + $0x30] ss:$8 sps:$4 sm:$0xff]   ;;  %v891_v35 = vld [vmem:[#allocation6 + $0x24] ss:$8 sps:$4 sm:$0xff]   ;;  %v889_v36 = vld [vmem:[#allocation6 + $0x20] ss:$8 sps:$4 sm:$0xff]   ;;  %v171_v13 = vlaneseq }
  0x41   :  { %267 = vmatprep.subr.bf16.mxu1 %v859_v14  ;;  %v894_v37 = vld [vmem:[#allocation6 + $0x14] ss:$8 sps:$4 sm:$0xff]   ;;  %v892_v38 = vld [vmem:[#allocation6 + $0x10] ss:$8 sps:$4 sm:$0xff]   ;;  %v897_v39 = vld [vmem:[#allocation6 + $0x4] ss:$8 sps:$4 sm:$0xff]  }
  0x42   :  { %v895_v40 = vld [vmem:[#allocation6] ss:$8 sps:$4 sm:$0xff]   ;;  %v900_v41 = vld [vmem:[#allocation6 + $0xf4] ss:$8 sps:$4 sm:$0xff]   ;;  %v898_v42 = vld [vmem:[#allocation6 + $0xf0] ss:$8 sps:$4 sm:$0xff]  }
  0x43   :  { %513 = vmatpush1.bf16.msra.mxu0 %v877_v28  ;;  %v903_v43 = vld [vmem:[#allocation6 + $0xe4] ss:$8 sps:$4 sm:$0xff]   ;;  %v901_v44 = vld [vmem:[#allocation6 + $0xe0] ss:$8 sps:$4 sm:$0xff]   ;;  %v906_v45 = vld [vmem:[#allocation6 + $0xd4] ss:$8 sps:$4 sm:$0xff]  }
  0x44   :  { %268 = vmatpush1.bf16.msra.mxu1 %v861_v15  ;;  %514 = vmatprep.subr.bf16.mxu0 %v882_v29  ;;  %v904_v46 = vld [vmem:[#allocation6 + $0xd0] ss:$8 sps:$4 sm:$0xff]   ;;  %v909_v47 = vld [vmem:[#allocation6 + $0xc4] ss:$8 sps:$4 sm:$0xff]   ;;  %v907_v48 = vld [vmem:[#allocation6 + $0xc0] ss:$8 sps:$4 sm:$0xff]  }
  0x45   :  { %269 = vmatprep.subr.bf16.mxu1 %v862_v16  ;;  %v912_v49 = vld [vmem:[#allocation6 + $0xb4] ss:$8 sps:$4 sm:$0xff]   ;;  %v910_v50 = vld [vmem:[#allocation6 + $0xb0] ss:$8 sps:$4 sm:$0xff]   ;;  %v915_v51 = vld [vmem:[#allocation6 + $0xa4] ss:$8 sps:$4 sm:$0xff]  }
  0x46   :  { %v913_v52 = vld [vmem:[#allocation6 + $0xa0] ss:$8 sps:$4 sm:$0xff]   ;;  %v739_v53 = vld [vmem:[#allocation4] ss:$0 sm:$0xff]  ;;  %v916_v62 = vld [vmem:[#allocation6 + $0x90] ss:$8 sps:$4 sm:$0xff]  }
  0x47   :  { %515 = vmatpush1.bf16.msra.mxu0 %v880_v30  ;;  %v918_v61 = vld [vmem:[#allocation6 + $0x94] ss:$8 sps:$4 sm:$0xff]   ;;  %v921_v63 = vld [vmem:[#allocation6 + $0x84] ss:$8 sps:$4 sm:$0xff]   ;;  %v919_v0 = vld [vmem:[#allocation6 + $0x80] ss:$8 sps:$4 sm:$0xff]  }
  0x48   :  { %270 = vmatpush1.bf16.msra.mxu1 %v864_v17  ;;  %516 = vmatprep.subr.bf16.mxu0 %v885_v31  ;;  %v923_v2 = vld [vmem:[%s1213_s7 + $0x38] sm:$0xff]   ;;  %v924_v3 = vld [vmem:[%s1213_s7 + $0x70] sm:$0xff]   ;;  %v926_v5 = vld [vmem:[%s1213_s7 + $0x68] sm:$0xff]   ;;  %v172_v14 = vshrl.u32 %v171_v13, 7 }
  0x49   :  { %271 = vmatprep.subr.bf16.mxu1 %v865_v18  ;;  %v925_v4 = vld [vmem:[%s1213_s7 + $0x30] sm:$0xff]   ;;  %v927_v6 = vld [vmem:[%s1213_s7 + $0x28] sm:$0xff]   ;;  %v928_v7 = vld [vmem:[%s1213_s7 + $0x60] sm:$0xff]  }
  0x4a   :  { %v929_v8 = vld [vmem:[%s1213_s7 + $0x20] sm:$0xff]   ;;  %v930_v9 = vld [vmem:[%s1213_s7 + $0x58] sm:$0xff]   ;;  %v932_v11 = vld [vmem:[%s1213_s7 + $0x50] sm:$0xff]   ;;  %v173_v15 = vsub.s32 0, %v172_v14  ;;  %v177_v17 = vsub.s32 1, %v172_v14 }
  0x4b   :  { %517 = vmatpush1.bf16.msra.mxu0 %v883_v32  ;;  %v931_v10 = vld [vmem:[%s1213_s7 + $0x18] sm:$0xff]   ;;  %v933_v12 = vld [vmem:[%s1213_s7 + $0x10] sm:$0xff]   ;;  %v169_v16 = vld [vmem:[%s1210_s4] sm:$0x3] }
  0x4c   :  { %272 = vmatpush1.bf16.msra.mxu1 %v867_v19  ;;  %518 = vmatprep.subr.bf16.mxu0 %v888_v33  ;;  %v174_v18 = vrot.slane %v169_v16, %v173_v15  ;;  %v178_v19 = vrot.slane %v169_v16, %v177_v17  ;;  %v934_v30 = vld [vmem:[%s1213_s7 + $0x48] sm:$0xff]   ;;  %v936_v32 = vld [vmem:[%s1213_s7 + $0x40] sm:$0xff]  }
  0x4d   :  { %273 = vmatprep.subr.bf16.mxu1 %v868_v20  ;;  %v935_v31 = vld [vmem:[%s1213_s7 + $0x8] sm:$0xff]   ;;  %v937_v33 = vld [vmem:[%s1213_s7] sm:$0xff]  }
  0x4f   :  { %519 = vmatpush1.bf16.msra.mxu0 %v886_v34  ;;  %v338_v34 = vld [vmem:[%s1212_s6] sm:$0x3] }
  0x50   :  { %274 = vmatpush1.bf16.msra.mxu1 %v870_v21  ;;  %520 = vmatprep.subr.bf16.mxu0 %v891_v35  ;;  %v343_v35 = vrot.slane %v338_v34, %v173_v15 }
  0x51   :  { %275 = vmatprep.subr.bf16.mxu1 %v871_v22 }
  0x53   :  { %521 = vmatpush1.bf16.msra.mxu0 %v889_v36  ;;  %v347_v36 = vrot.slane %v338_v34, %v177_v17 }
  0x54   :  { %276 = vmatpush1.bf16.msra.mxu1 %v873_v23  ;;  %522 = vmatprep.subr.bf16.mxu0 %v894_v37 }
  0x55   :  { %809 = vmatprep.subr.bf16.mxu1 %v922_v1 }
  0x57   :  { %523 = vmatpush1.bf16.msra.mxu0 %v892_v38 }
  0x58   :  { %524 = vmatprep.subr.bf16.mxu0 %v897_v39 }
  0x5b   :  { %525 = vmatpush1.bf16.msra.mxu0 %v895_v40 }
  0x5c   :  { %526 = vmatprep.subr.bf16.mxu0 %v900_v41 }
  0x5f   :  { %527 = vmatpush2.bf16.msra.mxu0 %v898_v42 }
  0x60   :  { %528 = vmatprep.subr.bf16.mxu0 %v903_v43 }
  0x63   :  { %529 = vmatpush2.bf16.msra.mxu0 %v901_v44 }
  0x64   :  { %530 = vmatprep.subr.bf16.mxu0 %v906_v45 }
  0x67   :  { %531 = vmatpush2.bf16.msra.mxu0 %v904_v46 }
  0x68   :  { %532 = vmatprep.subr.bf16.mxu0 %v909_v47 }
  0x6b   :  { %533 = vmatpush2.bf16.msra.mxu0 %v907_v48  ;;  %v790_v48 = vld [vmem:[#allocation7] ss:$0 sm:$0xff] }
  0x6c   :  { %534 = vmatprep.subr.bf16.mxu0 %v912_v49 }
  0x6f   :  { %535 = vmatpush2.bf16.msra.mxu0 %v910_v50 }
  0x70   :  { %536 = vmatprep.subr.bf16.mxu0 %v915_v51 }
  0x73   :  { %537 = vmatpush2.bf16.msra.mxu0 %v913_v52 }
  0x74   :  { %538 = vmatprep.subr.bf16.mxu0 %v918_v61 }
  0x77   :  { %539 = vmatpush2.bf16.msra.mxu0 %v916_v62 }
  0x78   :  { %540 = vmatprep.subr.bf16.mxu0 %v921_v63 }
  0x7b   :  { %541 = vmatpush2.bf16.msra.mxu0 %v919_v0 }
  0xfe   :  { %v145_v54 = vpop.f32.mrf.mxu0 }
  0xff   :  { %v146_v55 = vadd.f32 %v739_v53, %v145_v54 }
 0x100   :  { %v835_v56 = vpop.f32.mrf.mxu0 }
 0x101   :  { %v151_v57 = vmax.f32 %v146_v55, 0.0 }
 0x102   :  { %v148_v58 = vpop.f32.mrf.mxu0 }
 0x103   :  { %v152_v59 = vpack.c.bf16 %v151_v57, %v151_v57 }
 0x104   :  { %v836_v60 = vpop.f32.mrf.mxu0 }
 0x105   :  { %294 = vmatmul.mubr.bf16.vlgmr.msra.gmra.mxu1 %v152_v59 }
 0x106   :  { %810 = vmatpush3.bf16.msra.mxu1 %v923_v2 }
 0x107   :  { %811 = vmatprep.subr.bf16.mxu1 %v924_v3 }
 0x10a   :  { %812 = vmatpush3.bf16.msra.mxu1 %v925_v4 }
 0x10b   :  { %813 = vmatprep.subr.bf16.mxu1 %v926_v5 }
 0x10e   :  { %814 = vmatpush3.bf16.msra.mxu1 %v927_v6 }
 0x10f   :  { %815 = vmatprep.subr.bf16.mxu1 %v928_v7 }
 0x112   :  { %816 = vmatpush3.bf16.msra.mxu1 %v929_v8 }
 0x113   :  { %817 = vmatprep.subr.bf16.mxu1 %v930_v9 }
 0x116   :  { %818 = vmatpush3.bf16.msra.mxu1 %v931_v10 }
 0x117   :  { %819 = vmatprep.subr.bf16.mxu1 %v932_v11 }
 0x11a   :  { %820 = vmatpush3.bf16.msra.mxu1 %v933_v12 }
 0x11b   :  { %821 = vmatprep.subr.bf16.mxu1 %v934_v30 }
 0x11e   :  { %822 = vmatpush3.bf16.msra.mxu1 %v935_v31 }
 0x11f   :  { %823 = vmatprep.subr.bf16.mxu1 %v936_v32 }
 0x122   :  { %824 = vmatpush3.bf16.msra.mxu1 %v937_v33 }
 0x1c5   :  { %v295_v20 = vpop.f32.mrf.mxu1 }
 0x1c6   :  { %v296_v21 = vadd.f32 %v295_v20, %v174_v18 }
 0x1c7   :  { %v297_v22 = vpop.f32.mrf.mxu1 }
 0x1c8   :  { %v298_v23 = vadd.f32 %v297_v22, %v178_v19  ;;  %v302_v24 = vmax.f32 %v296_v21, 0.0 }
 0x1c9   :  { %v299_v25 = vpop.f32.mrf.mxu1 }
 0x1ca   :  { %v303_v26 = vmax.f32 %v298_v23, 0.0  ;;  %v304_v29 = vpack.c.bf16 %v302_v24, %v302_v24 }
 0x1cb   :  { %v300_v27 = vpop.f32.mrf.mxu1 }
 0x1cc   :  { %v305_v28 = vpack.c.bf16 %v303_v26, %v303_v26 }
 0x1ce   :  { %542 = vmatprep.mubr.bf16.mxu0 %v305_v28 }
 0x1cf   :  { %543 = vmatmul.mubr.bf16.vlgmr.msra.gmra.mxu0 %v304_v29 }
 0x28f   :  { %v544_v37 = vpop.f32.mrf.mxu0 }
 0x290   :  { %v545_v38 = vadd.f32 %v544_v37, %v343_v35 }
 0x291   :  { %v546_v39 = vpop.f32.mrf.mxu0 }
 0x292   :  { %v547_v40 = vadd.f32 %v546_v39, %v347_v36  ;;  %v551_v41 = vmax.f32 %v545_v38, 0.0 }
 0x293   :  { %v548_v42 = vpop.f32.mrf.mxu0 }
 0x294   :  { %v552_v43 = vmax.f32 %v547_v40, 0.0  ;;  %v553_v46 = vpack.c.bf16 %v551_v41, %v551_v41 }
 0x295   :  { %v549_v44 = vpop.f32.mrf.mxu0 }
 0x296   :  { %v554_v45 = vpack.c.bf16 %v552_v43, %v552_v43 }
 0x298   :  { %722 = vmatprep.mubr.bf16.mxu1 %v554_v45 }
 0x299   :  { %723 = vmatmul.mubr.bf16.vlgmr.msra.gmra.mxu1 %v553_v46 }
 0x359   :  { %v825_v47 = vpop.f32.mrf.mxu1 }
 0x35b   :  { %v826_v49 = vpop.f32.mrf.mxu1 }
 0x35c   :  { %v827_v50 = vadd.f32 %v826_v49, %v825_v47 }
 0x35d   :  { %v828_v51 = vpop.f32.mrf.mxu1 }
 0x35e   :  { %v725_v52 = vadd.f32 %v827_v50, %v790_v48 }
 0x35f   :  { %v829_v53 = vpop.f32.mrf.mxu1 }
 0x360   :  { %731 = vst.msk [vmem:[%s1215_s9] sm:$0xff] %vm730_vm4, %v725_v52 }
 0x361   :  { %736 = vsyncpa [#allocation3], 1 }
 0x362   :  { %737 = vsyncpa [#allocation5], 1 }
 0x363   :  { %738 = vsyncpa [#allocation8], 1 }

</bundles_post_ra>
